<compile_context>
chip_gen: v6e
topology: v6e:2x2x1
jax: 0.10.0
libtpu: 0.0.40
codegen_flags: <defaults>
</compile_context>

<pallas_src>
import math

import jax
import jax.numpy as jnp
from jax.experimental import pallas as pl
from jax.experimental.pallas import tpu as pltpu


def _add_pos_kernel(src_ref, pos_ref, out_ref):
    # with_pos_embed: out = src + pos.  Cast pos in-kernel (free VPU slot).
    out_ref[...] = src_ref[...] + pos_ref[...].astype(out_ref.dtype)


def _choose_2d_shape(shape):
    """Flatten an arbitrary shape to a lane-dense (rows, lanes) slab.

    Only lane widths that are multiples of 128 are accepted (unmasked stores),
    trying wide candidates first.  Returns None if the total element count is
    not divisible by 128; the wrapper then falls back to a plain (XLA-fusable)
    add instead of a heavily-masked Pallas store path.
    """
    total = math.prod(shape)
    if total == 0 or total % 128 != 0:
        return None
    for lanes in (4096, 2048, 1024, 512, 256, 128):
        if total % lanes == 0:
            return total // lanes, lanes
    return None


def _choose_row_tile(rows, lanes, itemsize, target_block_bytes):
    """Byte-targeted row tile.

    Largest multiple of 8 with tr*lanes*itemsize ~= target_block_bytes,
    clamped to [8, rows]; when cheap, snapped down to a divisor of rows so the
    last grid step is not a masked partial block.
    """
    if rows <= 8:
        return rows
    tr = (target_block_bytes // (lanes * itemsize)) // 8 * 8
    tr = max(8, min(tr, rows))
    if rows % tr != 0:
        # Prefer a nearby divisor of rows (multiple of 8) -> no masked epilogue.
        cand = tr
        lo = max(8, tr // 2)
        while cand >= lo:
            if rows % cand == 0:
                return cand
            cand -= 8
    return tr


def transformer_empty_encoder_forward(src, src_mask=None,
                                      src_key_padding_mask=None, pos=None,
                                      *, target_block_bytes=2 << 20):
    """Pallas implementation of TransformerEmptyEncoder.forward.

    src: (S, B, C) array, pos: optional array of the same shape (any float
    dtype).  Returns (src_with_pos, sgdt_output_list) exactly like the PyTorch
    module.  src_mask / src_key_padding_mask are accepted but unused (as in
    PyTorch).
    """
    sgdt_output_list = []  # module always returns an empty list

    if pos is None:
        # No compute at all: returning src is zero-cost (skip the kernel).
        return src, sgdt_output_list

    orig_shape = src.shape
    shape2d = _choose_2d_shape(orig_shape)
    if shape2d is None:
        # Awkward element count (e.g. tiny channel dims like C=3): a Pallas
        # path would run fully masked stores at <3% lane utilization, so let
        # XLA emit / fuse the add instead.  Numerically identical.
        return src + pos.astype(src.dtype), sgdt_output_list

    rows, lanes = shape2d
    src2d = src.reshape(rows, lanes)
    pos2d = pos.reshape(rows, lanes)

    itemsize = jnp.dtype(src.dtype).itemsize
    pos_itemsize = jnp.dtype(pos.dtype).itemsize
    tr = _choose_row_tile(rows, lanes, itemsize, target_block_bytes)
    grid = (pl.cdiv(rows, tr),)

    n = rows * lanes
    cost = pl.CostEstimate(flops=n, transcendentals=0,
                           bytes_accessed=n * (2 * itemsize + pos_itemsize))

    # Pipeline footprint: double-buffered src, pos and out blocks.  Bump the
    # scoped VMEM limit past v5e's 16 MiB default; cap well under v7x's 64 MiB
    # physical VMEM.
    block_bytes_all = tr * lanes * (2 * itemsize + pos_itemsize)
    vmem_needed = 2 * block_bytes_all
    vmem_limit = min(max(vmem_needed + (4 << 20), 32 << 20), 48 << 20)

    out2d = pl.pallas_call(
        _add_pos_kernel,
        out_shape=jax.ShapeDtypeStruct((rows, lanes), src.dtype),
        grid=grid,
        in_specs=[pl.BlockSpec((tr, lanes), lambda i: (i, 0)),
                  pl.BlockSpec((tr, lanes), lambda i: (i, 0))],
        out_specs=pl.BlockSpec((tr, lanes), lambda i: (i, 0)),
        compiler_params=pltpu.CompilerParams(
            dimension_semantics=("parallel",),
            vmem_limit_bytes=vmem_limit),
        cost_estimate=cost,
    )(src2d, pos2d)

    return out2d.reshape(orig_shape), sgdt_output_list


if __name__ == "__main__":
    # The module has no parameters (__init__ defines none), so nothing to init.
    key = jax.random.PRNGKey(0)
    k_src, k_pos = jax.random.split(key)

    S, B, C = 8, 2, 32  # seq, batch, hidden
    src = jax.random.normal(k_src, (S, B, C), dtype=jnp.float32)
    pos = jax.random.normal(k_pos, (S, B, C), dtype=jnp.float32)

    out, sgdt_list = transformer_empty_encoder_forward(src, pos=pos)
    out = jax.block_until_ready(out)

    # Reference check against plain JAX semantics of the PyTorch module.
    ref = src + pos
    assert out.shape == (S, B, C)
    assert out.dtype == src.dtype
    assert sgdt_list == []
    assert jnp.allclose(out, ref, atol=1e-6, rtol=1e-6)

    # pos=None path: pure pass-through, no kernel launched.
    out_none, lst_none = transformer_empty_encoder_forward(src, pos=None)
    out_none = jax.block_until_ready(out_none)
    assert lst_none == []
    assert jnp.allclose(out_none, src)

    # Mixed-dtype pos: the cast happens inside the kernel (no extra HBM pass).
    pos_bf16 = pos.astype(jnp.bfloat16)
    out_mix, _ = transformer_empty_encoder_forward(src, pos=pos_bf16)
    out_mix = jax.block_until_ready(out_mix)
    assert out_mix.dtype == src.dtype
    assert jnp.allclose(out_mix, src + pos_bf16.astype(jnp.float32), atol=1e-2)

    # Multi-block grid path: shrink the byte target so several row tiles are
    # streamed (exercises the pipelined BlockSpec path with a small input).
    S2, B2, C2 = 256, 2, 128
    k2a, k2b = jax.random.split(jax.random.PRNGKey(1))
    src2 = jax.random.normal(k2a, (S2, B2, C2), dtype=jnp.float32)
    pos2 = jax.random.normal(k2b, (S2, B2, C2), dtype=jnp.float32)
    out2, _ = transformer_empty_encoder_forward(src2, pos=pos2,
                                                target_block_bytes=64 * 1024)
    out2 = jax.block_until_ready(out2)
    assert jnp.allclose(out2, src2 + pos2, atol=1e-6, rtol=1e-6)

    # Awkward channel count (C=3, total not a multiple of 128): plain-add
    # fallback, still numerically exact.
    src3 = jax.random.normal(k_src, (8, 2, 3), dtype=jnp.float32)
    pos3 = jax.random.normal(k_pos, (8, 2, 3), dtype=jnp.float32)
    out3, _ = transformer_empty_encoder_forward(src3, pos=pos3)
    out3 = jax.block_until_ready(out3)
    assert jnp.allclose(out3, src3 + pos3, atol=1e-6, rtol=1e-6)

    print("KERNEL_OK")
</pallas_src>

<mosaic_0001>
module attributes {stable_mosaic.version = 11 : i64} {
  func.func @_add_pos_kernel(%arg0: i32, %arg1: memref<1x512xf32, #tpu.memory_space<vmem>>, %arg2: memref<1x512xf32, #tpu.memory_space<vmem>>, %arg3: memref<1x512xf32, #tpu.memory_space<vmem>>) attributes {dimension_semantics = [#tpu.dimension_semantics<parallel>], iteration_bounds = array<i64: 1>, scalar_prefetch = 0 : i64, scratch_operands = 0 : i64, tpu.core_type = #tpu.core_type<tc>, window_params = [{transform_indices = @transform_0, window_bounds = array<i64: 1, 512>}, {transform_indices = @transform_1, window_bounds = array<i64: 1, 512>}, {transform_indices = @transform_2, window_bounds = array<i64: 1, 512>}]} {
    %c0 = arith.constant 0 : index
    %c0_0 = arith.constant 0 : index
    %0 = vector.load %arg1[%c0, %c0_0] : memref<1x512xf32, #tpu.memory_space<vmem>>, vector<1x512xf32>
    %c0_1 = arith.constant 0 : index
    %c0_2 = arith.constant 0 : index
    %1 = vector.load %arg2[%c0_1, %c0_2] : memref<1x512xf32, #tpu.memory_space<vmem>>, vector<1x512xf32>
    %2 = arith.addf %0, %1 : vector<1x512xf32>
    %c0_3 = arith.constant 0 : index
    %c0_4 = arith.constant 0 : index
    %3 = vector.load %arg3[%c0_3, %c0_4] : memref<1x512xf32, #tpu.memory_space<vmem>>, vector<1x512xf32>
    tpu.vector_store %arg3[%c0_3, %c0_4], %2 {strides = array<i32>} : memref<1x512xf32, #tpu.memory_space<vmem>>, vector<1x512xf32>,
    return
  }
  func.func @transform_0(%arg0: i32) -> (i32, i32) {
    %c0_i32 = arith.constant 0 : i32
    %c0_i32_0 = arith.constant 0 : i32
    return %arg0, %c0_i32 : i32, i32
  }
  func.func @transform_1(%arg0: i32) -> (i32, i32) {
    %c0_i32 = arith.constant 0 : i32
    %c0_i32_0 = arith.constant 0 : i32
    return %arg0, %c0_i32 : i32, i32
  }
  func.func @transform_2(%arg0: i32) -> (i32, i32) {
    %c0_i32 = arith.constant 0 : i32
    %c0_i32_0 = arith.constant 0 : i32
    return %arg0, %c0_i32 : i32, i32
  }
}

</mosaic_0001>

<bundles_post_ra>
// kernel: tpu_custom_call.1
= control target key start
LH: loop header
LB: loop body
LE: loop exit
PB: predicated region body
PF: predicated region fallthrough
CT: control target
= control target key end

     0   :  { %7 = vsyncpa [#allocation3], 0  ;;  %s156_s0 = inlined_call_operand.hbm [shape: f32[1,512], index: 0, kind: input, shape index: {}]   ;;  %s157_s1 = inlined_call_operand.hbm [shape: f32[1,512], index: 1, kind: input, shape index: {}]   ;;  %s158_s2 = inlined_call_operand.hbm [shape: f32[1,512], index: 2, kind: output, shape index: {}]  }
   0x1   :  { %8 = vsyncpa [#allocation6], 0 }
   0x2   :  { %9 = vsyncpa [#allocation4], 0  ;;  %s129_s9 = smov [#allocation2]   ;;  %s130_s11 = smov [#allocation5]  }
   0x3   :  { %s16_s10 = sshll.u32 %s129_s9, 4  ;;  %s26_s12 = sshll.u32 %s130_s11, 4  ;;  %s17_s10 = int_to_ptr.vmem [resolvable:$true] %s16_s10  ;;  %s27_s12 = int_to_ptr.vmem [resolvable:$true] %s26_s12 }
   0x4   :  { %s71_s13 = scalar_lea.vmem %s17_s10, 64  ;;  %p76_p1 = scmp.lt.s32.totalorder %s17_s10, %s17_s10 }
   0x5   :  { %p72_p0 = scmp.ne.s32.totalorder %s17_s10, %s71_s13  ;;  %p77_p2 = scmp.lt.s32.totalorder %s71_s13, %s71_s13 }
   0x7   :  { %p78_p3 = por %p77_p2, %p76_p1 }
   0x9   :  { %p79_p4 = pnand %p78_p3, %p72_p0 }
   0xb   :  { %82 = shalt.err (!%p79_p4)
}
   0xc   :  { %19 = dma.hbm_to_vmem [thread:$0]  %s156_s0, 64, %s17_s10, [#allocation3]  }
   0xd   :  { %s91_s16 = scalar_lea.vmem %s27_s12, 64  ;;  %p96_p6 = scmp.lt.s32.totalorder %s27_s12, %s27_s12 }
   0xe   :  { %p92_p5 = scmp.ne.s32.totalorder %s27_s12, %s91_s16  ;;  %p97_p7 = scmp.lt.s32.totalorder %s91_s16, %s91_s16 }
  0x10   :  { %p98_p8 = por %p97_p7, %p96_p6 }
  0x12   :  { %p99_p9 = pnand %p98_p8, %p92_p5 }
  0x14   :  { %102 = shalt.err (!%p99_p9)
}
  0x15   :  { %29 = dma.hbm_to_vmem [thread:$0]  %s157_s1, 64, %s27_s12, [#allocation6]  }
  0x16   :  { %123 = dma.done.wait [#allocation3], 64  }
  0x17   :  { %124 = vsyncadd [#allocation3], 4294967232 }
  0x18   :  { %125 = dma.done.wait [#allocation6], 64  }
  0x19   :  { %126 = vsyncadd [#allocation6], 4294967232  ;;  %v39_v0 = vlaneseq  ;;  %s131_s19 = smov [#allocation7]   ;;  %v36_v1 = vld [vmem:[#allocation2] sm:$0xf] }
  0x1a   :  { %s50_s20 = sshll.u32 %s131_s19, 4  ;;  %v37_v2 = vld [vmem:[#allocation5] sm:$0xf]  ;;  %s51_s20 = int_to_ptr.vmem [resolvable:$true] %s50_s20 }
  0x1b   :  { %vm41_vm0 = vcmp.lt.s32.totalorder %v39_v0, 512  ;;  %v38_v3 = vadd.f32 %v37_v2, %v36_v1  ;;  %s103_s0 = scalar_lea.vmem %s51_s20, 64  ;;  %p108_p11 = scmp.lt.s32.totalorder %s51_s20, %s51_s20 }
  0x1c   :  { %p104_p10 = scmp.ne.s32.totalorder %s51_s20, %s103_s0  ;;  %p109_p12 = scmp.lt.s32.totalorder %s103_s0, %s103_s0 }
  0x1d   :  { %43 = vst.msk [vmem:[#allocation7] sm:$0xf] %vm41_vm0, %v38_v3 }
  0x1e   :  { %p110_p13 = por %p109_p12, %p108_p11 }
  0x20   :  { %p111_p0 = pnand %p110_p13, %p104_p10 }
  0x22   :  { %114 = shalt.err (!%p111_p0)
}
  0x23   :  { %53 = dma.vmem_to_hbm [thread:$0]  %s51_s20, 64, %s158_s2, [#allocation4]  }
  0x24   :  { %127 = dma.done.wait [#allocation4], 64  }
  0x25   :  { %128 = vsyncadd [#allocation4], 4294967232 }
  0x26   :  { %57 = vsyncpa [#allocation3], 1 }
  0x27   :  { %58 = vsyncpa [#allocation6], 1 }
  0x28   :  { %59 = vsyncpa [#allocation4], 1 }

</bundles_post_ra>
